<compile_context>
chip_gen: v5e
topology: v5e:2x2
jax: 0.10.0
libtpu: 0.0.40
codegen_flags: <defaults>
</compile_context>

<pallas_src>
import functools

import jax
import jax.numpy as jnp
from jax.experimental import pallas as pl
from jax.experimental.pallas import tpu as pltpu

LN_EPS = 1e-5  # torch.nn.LayerNorm default


def _round_up(x, m):
    return ((x + m - 1) // m) * m


def _pick_tiles(total, target, align):
    """Split `total` into `n` tiles of size `tile` (multiple of `align`,
    <= `target`), preferring the split with the least zero padding.
    Returns (tile, n, padded_total)."""
    total_a = _round_up(total, align)
    n0 = max(1, -(-total_a // target))
    best = None
    for n in (n0, n0 + 1, n0 + 2):
        tile = _round_up(-(-total_a // n), align)
        padded = n * tile
        if best is None or padded < best[2]:
            best = (tile, n, padded)
    return best


def actor_kernel(obs_ref,                      # (TB, TK)   bf16
                 w1_ref, b1_ref,               # (TK, Fp) bf16 / (1, Fp) f32
                 g_ref, beta_ref,              # LayerNorm gamma / beta (1, Fp) f32
                 w2_ref, b2_ref,               # (Fp, Hp) bf16 / (1, Hp) f32
                 w3_ref, b3_ref,               # (Hp, Hp) bf16 / (1, Hp) f32
                 w4_ref, b4_ref,               # (Hp, Ap) bf16 / (1, Ap) f32
                 mu_ref,                       # (TB, Ap) f32 output block (batch tile i)
                 acc_ref,                      # (Bt, TB, Fp) f32 trunk accumulators
                 *, feature_dim):
    k = pl.program_id(0)               # repr_dim (reduction) axis -- OUTER
    i = pl.program_id(1)               # batch-tile axis           -- INNER
    nk = pl.num_programs(0)

    # Trunk Linear partial product for this (batch tile, K tile).
    part = jnp.dot(obs_ref[...], w1_ref[...], preferred_element_type=jnp.float32)

    @pl.when(k == 0)
    def _():
        # Fold the trunk bias into the accumulator init (saves an epilogue add).
        acc_ref[i] = part + b1_ref[...]

    @pl.when(k != 0)
    def _():
        acc_ref[i] = acc_ref[i] + part

    @pl.when(k == nk - 1)
    def _():
        h = acc_ref[i]
        # LayerNorm over the *real* feature_dim lanes.  Padded lanes of h are
        # exactly 0 (zero-padded w1 columns / b1), so the sum over all lanes
        # divided by feature_dim gives the exact mean; the centered values on
        # padded lanes are masked back to 0 so the two-pass variance only sees
        # real lanes (numerically safer than E[x^2] - E[x]^2).
        inv_f = 1.0 / float(feature_dim)
        mean = jnp.sum(h, axis=-1, keepdims=True) * inv_f
        centered = h - mean
        if feature_dim != h.shape[-1]:
            lane = jax.lax.broadcasted_iota(jnp.int32, h.shape, 1)
            centered = jnp.where(lane < feature_dim, centered, 0.0)
        var = jnp.sum(centered * centered, axis=-1, keepdims=True) * inv_f
        hn = centered * jax.lax.rsqrt(var + LN_EPS)
        # padded gamma/beta are 0, so padded lanes of hn stay 0.
        hn = jnp.tanh(hn * g_ref[...] + beta_ref[...])

        # ---- policy MLP: Linear -> ReLU -> Linear -> ReLU -> Linear -> tanh ----
        x = jnp.dot(hn.astype(w2_ref.dtype), w2_ref[...],
                    preferred_element_type=jnp.float32) + b2_ref[...]
        x = jnp.maximum(x, 0.0)
        x = jnp.dot(x.astype(w3_ref.dtype), w3_ref[...],
                    preferred_element_type=jnp.float32) + b3_ref[...]
        x = jnp.maximum(x, 0.0)
        mu = jnp.dot(x.astype(w4_ref.dtype), w4_ref[...],
                     preferred_element_type=jnp.float32) + b4_ref[...]
        mu_ref[...] = jnp.tanh(mu)


def _pad2(x, rows, cols, dtype):
    return jnp.pad(x, ((0, rows - x.shape[0]), (0, cols - x.shape[1]))).astype(dtype)


def _pad_row(x, cols, dtype):
    return jnp.pad(x, (0, cols - x.shape[0])).reshape(1, cols).astype(dtype)


def prepare_params(params, *, matmul_dtype=jnp.bfloat16, max_k_tile=2048):
    """Pad + cast the actor weights ONCE, outside the per-step forward call.

    Per-call pad/cast of w1 (~10-20 MB for DrQ-v2 repr_dim) adds HBM traffic
    comparable to the kernel itself, so it must not sit on the hot path.
    """
    repr_dim, feature_dim = params["w1"].shape
    hidden_dim = params["w2"].shape[1]
    action_dim = params["w4"].shape[1]

    TK, nk, Rp = _pick_tiles(repr_dim, max_k_tile, 128)
    Fp = _round_up(feature_dim, 128)
    Hp = _round_up(hidden_dim, 128)
    Ap = _round_up(action_dim, 128)

    arrays = dict(
        w1=_pad2(params["w1"], Rp, Fp, matmul_dtype),
        b1=_pad_row(params["b1"], Fp, jnp.float32),
        gamma=_pad_row(params["gamma"], Fp, jnp.float32),
        beta=_pad_row(params["beta"], Fp, jnp.float32),
        w2=_pad2(params["w2"], Fp, Hp, matmul_dtype),
        b2=_pad_row(params["b2"], Hp, jnp.float32),
        w3=_pad2(params["w3"], Hp, Hp, matmul_dtype),
        b3=_pad_row(params["b3"], Hp, jnp.float32),
        w4=_pad2(params["w4"], Hp, Ap, matmul_dtype),
        b4=_pad_row(params["b4"], Ap, jnp.float32),
    )
    meta = dict(repr_dim=repr_dim, feature_dim=feature_dim, hidden_dim=hidden_dim,
                action_dim=action_dim, Rp=Rp, TK=TK, nk=nk, Fp=Fp, Hp=Hp, Ap=Ap,
                matmul_dtype=matmul_dtype)
    return {"arrays": arrays, "meta": meta}


def actor_forward(obs, prepared, std_scalar, *, max_b_tile=256):
    """Returns (mu, std) — the parameters of the TruncatedNormal distribution."""
    arrs, meta = prepared["arrays"], prepared["meta"]
    B, repr_dim = obs.shape
    assert repr_dim == meta["repr_dim"]
    Rp, TK, nk = meta["Rp"], meta["TK"], meta["nk"]
    Fp, Hp, Ap = meta["Fp"], meta["Hp"], meta["Ap"]
    feature_dim, action_dim = meta["feature_dim"], meta["action_dim"]
    mm_dtype = meta["matmul_dtype"]

    TB, Bt, Bp = _pick_tiles(B, max_b_tile, 8)

    # TODO(synk): in production the encoder should emit bf16 directly so this
    # cast (and ideally the pad) disappears from the hot path.
    obs_p = obs.astype(mm_dtype)
    if (Bp - B) or (Rp - repr_dim):
        obs_p = jnp.pad(obs_p, ((0, Bp - B), (0, Rp - repr_dim)))

    # VMEM budget: double-buffered streamed blocks (obs, w1), resident
    # (double-buffered) MLP weights, output block, accumulators, epilogue temps.
    mm_bytes = jnp.dtype(mm_dtype).itemsize
    resident = (
        2 * TB * TK * mm_bytes
        + 2 * TK * Fp * mm_bytes
        + 2 * ((Fp * Hp + Hp * Hp + Hp * Ap) * mm_bytes + (3 * Fp + 2 * Hp + Ap) * 4)
        + 2 * TB * Ap * 4
        + Bt * TB * Fp * 4
        + 4 * TB * max(Fp, Hp) * 4
    )
    vmem_limit = int(min(max(resident + (8 << 20), 32 << 20), 48 << 20))

    kernel = functools.partial(actor_kernel, feature_dim=feature_dim)

    mu_pad = pl.pallas_call(
        kernel,
        out_shape=jax.ShapeDtypeStruct((Bp, Ap), jnp.float32),
        grid_spec=pltpu.PrefetchScalarGridSpec(
            num_scalar_prefetch=0,
            grid=(nk, Bt),                                    # K OUTER: w1 streamed exactly once
            in_specs=[
                pl.BlockSpec((TB, TK), lambda k, i: (i, k)),  # obs
                pl.BlockSpec((TK, Fp), lambda k, i: (k, 0)),  # w1 (re-fetched only when k changes)
                pl.BlockSpec((1, Fp), lambda k, i: (0, 0)),   # b1
                pl.BlockSpec((1, Fp), lambda k, i: (0, 0)),   # gamma
                pl.BlockSpec((1, Fp), lambda k, i: (0, 0)),   # beta
                pl.BlockSpec((Fp, Hp), lambda k, i: (0, 0)),  # w2
                pl.BlockSpec((1, Hp), lambda k, i: (0, 0)),   # b2
                pl.BlockSpec((Hp, Hp), lambda k, i: (0, 0)),  # w3
                pl.BlockSpec((1, Hp), lambda k, i: (0, 0)),   # b3
                pl.BlockSpec((Hp, Ap), lambda k, i: (0, 0)),  # w4
                pl.BlockSpec((1, Ap), lambda k, i: (0, 0)),   # b4
            ],
            out_specs=pl.BlockSpec((TB, Ap), lambda k, i: (i, 0)),
            scratch_shapes=[pltpu.VMEM((Bt, TB, Fp), jnp.float32)],
        ),
        compiler_params=pltpu.CompilerParams(
            dimension_semantics=("arbitrary", "arbitrary"),
            vmem_limit_bytes=vmem_limit,
        ),
    )(obs_p, arrs["w1"], arrs["b1"], arrs["gamma"], arrs["beta"],
      arrs["w2"], arrs["b2"], arrs["w3"], arrs["b3"], arrs["w4"], arrs["b4"])

    mu = mu_pad[:B, :action_dim]
    # std is a constant broadcast — no kernel work needed.
    std = jnp.full((B, action_dim), std_scalar, dtype=mu.dtype)
    return mu, std


def init_params(key, repr_dim, feature_dim, hidden_dim, action_dim):
    # Deterministic synthetic init (stands in for weight_init / orthogonal init).
    ks = jax.random.split(key, 5)
    scale = 0.1
    return {
        "w1": scale * jax.random.normal(ks[0], (repr_dim, feature_dim), jnp.float32),
        "b1": jnp.zeros((feature_dim,), jnp.float32),
        "gamma": jnp.ones((feature_dim,), jnp.float32),
        "beta": jnp.zeros((feature_dim,), jnp.float32),
        "w2": scale * jax.random.normal(ks[1], (feature_dim, hidden_dim), jnp.float32),
        "b2": jnp.zeros((hidden_dim,), jnp.float32),
        "w3": scale * jax.random.normal(ks[2], (hidden_dim, hidden_dim), jnp.float32),
        "b3": jnp.zeros((hidden_dim,), jnp.float32),
        "w4": scale * jax.random.normal(ks[3], (hidden_dim, action_dim), jnp.float32),
        "b4": jnp.zeros((action_dim,), jnp.float32),
    }


def actor_forward_ref(obs, params, std_scalar, matmul_dtype=jnp.float32):
    mm = lambda a, w: jnp.dot(a.astype(matmul_dtype), w.astype(matmul_dtype),
                              preferred_element_type=jnp.float32)
    h = mm(obs, params["w1"]) + params["b1"]
    mean = jnp.mean(h, axis=-1, keepdims=True)
    var = jnp.mean(jnp.square(h - mean), axis=-1, keepdims=True)  # biased (torch)
    h = (h - mean) * jax.lax.rsqrt(var + LN_EPS) * params["gamma"] + params["beta"]
    h = jnp.tanh(h)
    x = jnp.maximum(mm(h, params["w2"]) + params["b2"], 0.0)
    x = jnp.maximum(mm(x, params["w3"]) + params["b3"], 0.0)
    mu = jnp.tanh(mm(x, params["w4"]) + params["b4"])
    return mu, jnp.full_like(mu, std_scalar)


if __name__ == "__main__":
    # TODO(synk): TruncatedNormal.sample (stochastic, straight-through clamp) is not
    # part of the forward graph; the kernel returns the distribution params (mu, std).
    key = jax.random.PRNGKey(0)
    std_scalar = 0.2

    # -- Test 1: tiny single-tile config (grid = (1, 1)). --
    B, repr_dim, feature_dim, hidden_dim, action_dim = 8, 64, 32, 32, 4
    k_obs, k_par, key = jax.random.split(key, 3)
    obs = jax.random.normal(k_obs, (B, repr_dim), jnp.float32)
    params = init_params(k_par, repr_dim, feature_dim, hidden_dim, action_dim)
    prepared = prepare_params(params)
    mu, std = actor_forward(obs, prepared, std_scalar)
    jax.block_until_ready((mu, std))

    mu_bf, _ = actor_forward_ref(obs, params, std_scalar, matmul_dtype=jnp.bfloat16)
    assert jnp.allclose(mu, mu_bf, atol=2e-3, rtol=2e-3), "test1: mu mismatch (bf16 ref)"
    mu_f32, std_f32 = actor_forward_ref(obs, params, std_scalar)
    assert jnp.allclose(mu, mu_f32, atol=2.5e-2, rtol=2.5e-2), "test1: mu mismatch (fp32 ref)"
    assert jnp.allclose(std, std_f32), "test1: std mismatch"
    assert mu.shape == (B, action_dim) and std.shape == (B, action_dim)

    # -- Test 2: multi-tile config (grid_K > 1 and several batch tiles) to
    #    exercise the K-outer accumulation, dynamic accumulator slots and the
    #    revisited-output writeback path. --
    B, repr_dim, feature_dim, hidden_dim, action_dim = 20, 300, 48, 40, 6
    k_obs, k_par, key = jax.random.split(key, 3)
    obs = jax.random.normal(k_obs, (B, repr_dim), jnp.float32)
    params = init_params(k_par, repr_dim, feature_dim, hidden_dim, action_dim)
    prepared = prepare_params(params, max_k_tile=128)
    mu, std = actor_forward(obs, prepared, std_scalar, max_b_tile=8)
    jax.block_until_ready((mu, std))

    mu_bf, _ = actor_forward_ref(obs, params, std_scalar, matmul_dtype=jnp.bfloat16)
    assert jnp.allclose(mu, mu_bf, atol=3e-3, rtol=3e-3), "test2: mu mismatch (bf16 ref)"
    mu_f32, _ = actor_forward_ref(obs, params, std_scalar)
    assert jnp.allclose(mu, mu_f32, atol=5e-2, rtol=5e-2), "test2: mu mismatch (fp32 ref)"
    assert mu.shape == (B, action_dim) and std.shape == (B, action_dim)

    print("KERNEL_OK")
</pallas_src>

<mosaic_0001>
module attributes {stable_mosaic.version = 11 : i64} {
  func.func @actor_kernel(%arg0: i32, %arg1: i32, %arg2: memref<8x128xbf16, #tpu.memory_space<vmem>>, %arg3: memref<128x128xbf16, #tpu.memory_space<vmem>>, %arg4: memref<1x128xf32, #tpu.memory_space<vmem>>, %arg5: memref<1x128xf32, #tpu.memory_space<vmem>>, %arg6: memref<1x128xf32, #tpu.memory_space<vmem>>, %arg7: memref<128x128xbf16, #tpu.memory_space<vmem>>, %arg8: memref<1x128xf32, #tpu.memory_space<vmem>>, %arg9: memref<128x128xbf16, #tpu.memory_space<vmem>>, %arg10: memref<1x128xf32, #tpu.memory_space<vmem>>, %arg11: memref<128x128xbf16, #tpu.memory_space<vmem>>, %arg12: memref<1x128xf32, #tpu.memory_space<vmem>>, %arg13: memref<8x128xf32, #tpu.memory_space<vmem>>, %arg14: memref<1x8x128xf32, #tpu.memory_space<vmem>>) attributes {dimension_semantics = [#tpu.dimension_semantics<arbitrary>, #tpu.dimension_semantics<arbitrary>], iteration_bounds = array<i64: 1, 1>, scalar_prefetch = 0 : i64, scratch_operands = 1 : i64, tpu.core_type = #tpu.core_type<tc>, window_params = [{transform_indices = @transform_0, window_bounds = array<i64: 8, 128>}, {transform_indices = @transform_1, window_bounds = array<i64: 128, 128>}, {pipeline_mode = #tpu.pipeline_mode<synchronous>, transform_indices = @transform_2, window_bounds = array<i64: 1, 128>}, {pipeline_mode = #tpu.pipeline_mode<synchronous>, transform_indices = @transform_3, window_bounds = array<i64: 1, 128>}, {pipeline_mode = #tpu.pipeline_mode<synchronous>, transform_indices = @transform_4, window_bounds = array<i64: 1, 128>}, {pipeline_mode = #tpu.pipeline_mode<synchronous>, transform_indices = @transform_5, window_bounds = array<i64: 128, 128>}, {pipeline_mode = #tpu.pipeline_mode<synchronous>, transform_indices = @transform_6, window_bounds = array<i64: 1, 128>}, {pipeline_mode = #tpu.pipeline_mode<synchronous>, transform_indices = @transform_7, window_bounds = array<i64: 128, 128>}, {pipeline_mode = #tpu.pipeline_mode<synchronous>, transform_indices = @transform_8, window_bounds = array<i64: 1, 128>}, {pipeline_mode = #tpu.pipeline_mode<synchronous>, transform_indices = @transform_9, window_bounds = array<i64: 128, 128>}, {pipeline_mode = #tpu.pipeline_mode<synchronous>, transform_indices = @transform_10, window_bounds = array<i64: 1, 128>}, {transform_indices = @transform_11, window_bounds = array<i64: 8, 128>}]} {
    %c0 = arith.constant 0 : index
    %c0_0 = arith.constant 0 : index
    %0 = vector.load %arg2[%c0, %c0_0] : memref<8x128xbf16, #tpu.memory_space<vmem>>, vector<8x128xbf16>
    %c0_1 = arith.constant 0 : index
    %c0_2 = arith.constant 0 : index
    %1 = vector.load %arg3[%c0_1, %c0_2] : memref<128x128xbf16, #tpu.memory_space<vmem>>, vector<128x128xbf16>
    %cst = arith.constant dense<0.000000e+00> : vector<8x128xf32>
    %2 = tpu.matmul %0, %1, %cst {dimension_numbers = #tpu.dot_dimension_numbers<[1], [0], [0], [1], [0, 0, 1, 1], [], []>} : vector<8x128xbf16>, vector<128x128xbf16>, vector<8x128xf32> -> vector<8x128xf32>
    %c0_i32 = arith.constant 0 : i32
    %3 = arith.cmpi eq, %arg0, %c0_i32 : i32
    %4 = arith.extui %3 : i1 to i32
    %c0_i32_3 = arith.constant 0 : i32
    %5 = arith.cmpi ne, %4, %c0_i32_3 : i32
    scf.if %5 {
      %c0_8 = arith.constant 0 : index
      %c0_9 = arith.constant 0 : index
      %12 = vector.load %arg4[%c0_8, %c0_9] : memref<1x128xf32, #tpu.memory_space<vmem>>, vector<1x128xf32>
      %13 = vector.broadcast %12 : vector<1x128xf32> to vector<8x128xf32>
      %14 = arith.addf %2, %13 : vector<8x128xf32>
      %15 = arith.index_cast %arg1 : i32 to index
      %c0_10 = arith.constant 0 : index
      %c0_11 = arith.constant 0 : index
      %16 = vector.load %arg14[%15, %c0_10, %c0_11] : memref<1x8x128xf32, #tpu.memory_space<vmem>>, vector<1x8x128xf32>
      %17 = vector.shape_cast %16 : vector<1x8x128xf32> to vector<8x128xf32>
      %18 = vector.shape_cast %14 : vector<8x128xf32> to vector<1x8x128xf32>
      tpu.vector_store %arg14[%15, %c0_10, %c0_11], %18 {strides = array<i32>} : memref<1x8x128xf32, #tpu.memory_space<vmem>>, vector<1x8x128xf32>,
    } else {
    }
    %c0_i32_4 = arith.constant 0 : i32
    %6 = arith.cmpi ne, %arg0, %c0_i32_4 : i32
    %7 = arith.extui %6 : i1 to i32
    %c0_i32_5 = arith.constant 0 : i32
    %8 = arith.cmpi ne, %7, %c0_i32_5 : i32
    scf.if %8 {
      %12 = arith.index_cast %arg1 : i32 to index
      %c0_8 = arith.constant 0 : index
      %c0_9 = arith.constant 0 : index
      %13 = vector.load %arg14[%12, %c0_8, %c0_9] : memref<1x8x128xf32, #tpu.memory_space<vmem>>, vector<1x8x128xf32>
      %14 = vector.shape_cast %13 : vector<1x8x128xf32> to vector<8x128xf32>
      %15 = arith.addf %14, %2 : vector<8x128xf32>
      %16 = arith.index_cast %arg1 : i32 to index
      %c0_10 = arith.constant 0 : index
      %c0_11 = arith.constant 0 : index
      %17 = vector.load %arg14[%16, %c0_10, %c0_11] : memref<1x8x128xf32, #tpu.memory_space<vmem>>, vector<1x8x128xf32>
      %18 = vector.shape_cast %17 : vector<1x8x128xf32> to vector<8x128xf32>
      %19 = vector.shape_cast %15 : vector<8x128xf32> to vector<1x8x128xf32>
      tpu.vector_store %arg14[%16, %c0_10, %c0_11], %19 {strides = array<i32>} : memref<1x8x128xf32, #tpu.memory_space<vmem>>, vector<1x8x128xf32>,
    } else {
    }
    %c0_i32_6 = arith.constant 0 : i32
    %9 = arith.cmpi eq, %arg0, %c0_i32_6 : i32
    %10 = arith.extui %9 : i1 to i32
    %c0_i32_7 = arith.constant 0 : i32
    %11 = arith.cmpi ne, %10, %c0_i32_7 : i32
    scf.if %11 {
      %12 = arith.index_cast %arg1 : i32 to index
      %c0_8 = arith.constant 0 : index
      %c0_9 = arith.constant 0 : index
      %13 = vector.load %arg14[%12, %c0_8, %c0_9] : memref<1x8x128xf32, #tpu.memory_space<vmem>>, vector<1x8x128xf32>
      %14 = vector.shape_cast %13 : vector<1x8x128xf32> to vector<8x128xf32>
      %cst_10 = arith.constant dense<0.000000e+00> : vector<8xf32>
      %15 = vector.multi_reduction <add>, %14, %cst_10 [1] : vector<8x128xf32> to vector<8xf32>
      %16 = vector.shape_cast %15 : vector<8xf32> to vector<8x1xf32>
      %cst_11 = arith.constant 3.125000e-02 : f32
      %17 = vector.broadcast %cst_11 : f32 to vector<8x1xf32>
      %18 = arith.mulf %16, %17 : vector<8x1xf32>
      %19 = vector.broadcast %18 : vector<8x1xf32> to vector<8x128xf32>
      %20 = arith.subf %14, %19 : vector<8x128xf32>
      %21 = tpu.iota {dimensions = array<i32: 1>} : vector<8x128xi32>
      %c32_i32 = arith.constant 32 : i32
      %22 = vector.broadcast %c32_i32 : i32 to vector<8x128xi32>
      %23 = arith.cmpi slt, %21, %22 : vector<8x128xi32>
      %cst_12 = arith.constant 0.000000e+00 : f32
      %24 = vector.broadcast %cst_12 : f32 to vector<8x128xf32>
      %25 = arith.select %23, %20, %24 : vector<8x128xi1>, vector<8x128xf32>
      %26 = arith.mulf %25, %25 : vector<8x128xf32>
      %cst_13 = arith.constant dense<0.000000e+00> : vector<8xf32>
      %27 = vector.multi_reduction <add>, %26, %cst_13 [1] : vector<8x128xf32> to vector<8xf32>
      %28 = vector.shape_cast %27 : vector<8xf32> to vector<8x1xf32>
      %cst_14 = arith.constant 3.125000e-02 : f32
      %29 = vector.broadcast %cst_14 : f32 to vector<8x1xf32>
      %30 = arith.mulf %28, %29 : vector<8x1xf32>
      %cst_15 = arith.constant 9.99999974E-6 : f32
      %31 = vector.broadcast %cst_15 : f32 to vector<8x1xf32>
      %32 = arith.addf %30, %31 : vector<8x1xf32>
      %33 = math.rsqrt %32 : vector<8x1xf32>
      %34 = vector.broadcast %33 : vector<8x1xf32> to vector<8x128xf32>
      %35 = arith.mulf %25, %34 : vector<8x128xf32>
      %c0_16 = arith.constant 0 : index
      %c0_17 = arith.constant 0 : index
      %36 = vector.load %arg5[%c0_16, %c0_17] : memref<1x128xf32, #tpu.memory_space<vmem>>, vector<1x128xf32>
      %37 = vector.broadcast %36 : vector<1x128xf32> to vector<8x128xf32>
      %38 = arith.mulf %35, %37 : vector<8x128xf32>
      %c0_18 = arith.constant 0 : index
      %c0_19 = arith.constant 0 : index
      %39 = vector.load %arg6[%c0_18, %c0_19] : memref<1x128xf32, #tpu.memory_space<vmem>>, vector<1x128xf32>
      %40 = vector.broadcast %39 : vector<1x128xf32> to vector<8x128xf32>
      %41 = arith.addf %38, %40 : vector<8x128xf32>
      %42 = math.tanh %41 : vector<8x128xf32>
      %43 = arith.truncf %42 : vector<8x128xf32> to vector<8x128xbf16>
      %c0_20 = arith.constant 0 : index
      %c0_21 = arith.constant 0 : index
      %44 = vector.load %arg7[%c0_20, %c0_21] : memref<128x128xbf16, #tpu.memory_space<vmem>>, vector<128x128xbf16>
      %cst_22 = arith.constant dense<0.000000e+00> : vector<8x128xf32>
      %45 = tpu.matmul %43, %44, %cst_22 {dimension_numbers = #tpu.dot_dimension_numbers<[1], [0], [0], [1], [0, 0, 1, 1], [], []>} : vector<8x128xbf16>, vector<128x128xbf16>, vector<8x128xf32> -> vector<8x128xf32>
      %c0_23 = arith.constant 0 : index
      %c0_24 = arith.constant 0 : index
      %46 = vector.load %arg8[%c0_23, %c0_24] : memref<1x128xf32, #tpu.memory_space<vmem>>, vector<1x128xf32>
      %47 = vector.broadcast %46 : vector<1x128xf32> to vector<8x128xf32>
      %48 = arith.addf %45, %47 : vector<8x128xf32>
      %cst_25 = arith.constant 0.000000e+00 : f32
      %49 = vector.broadcast %cst_25 : f32 to vector<8x128xf32>
      %50 = arith.maximumf %48, %49 : vector<8x128xf32>
      %51 = arith.truncf %50 : vector<8x128xf32> to vector<8x128xbf16>
      %c0_26 = arith.constant 0 : index
      %c0_27 = arith.constant 0 : index
      %52 = vector.load %arg9[%c0_26, %c0_27] : memref<128x128xbf16, #tpu.memory_space<vmem>>, vector<128x128xbf16>
      %cst_28 = arith.constant dense<0.000000e+00> : vector<8x128xf32>
      %53 = tpu.matmul %51, %52, %cst_28 {dimension_numbers = #tpu.dot_dimension_numbers<[1], [0], [0], [1], [0, 0, 1, 1], [], []>} : vector<8x128xbf16>, vector<128x128xbf16>, vector<8x128xf32> -> vector<8x128xf32>
      %c0_29 = arith.constant 0 : index
      %c0_30 = arith.constant 0 : index
      %54 = vector.load %arg10[%c0_29, %c0_30] : memref<1x128xf32, #tpu.memory_space<vmem>>, vector<1x128xf32>
      %55 = vector.broadcast %54 : vector<1x128xf32> to vector<8x128xf32>
      %56 = arith.addf %53, %55 : vector<8x128xf32>
      %cst_31 = arith.constant 0.000000e+00 : f32
      %57 = vector.broadcast %cst_31 : f32 to vector<8x128xf32>
      %58 = arith.maximumf %56, %57 : vector<8x128xf32>
      %59 = arith.truncf %58 : vector<8x128xf32> to vector<8x128xbf16>
      %c0_32 = arith.constant 0 : index
      %c0_33 = arith.constant 0 : index
      %60 = vector.load %arg11[%c0_32, %c0_33] : memref<128x128xbf16, #tpu.memory_space<vmem>>, vector<128x128xbf16>
      %cst_34 = arith.constant dense<0.000000e+00> : vector<8x128xf32>
      %61 = tpu.matmul %59, %60, %cst_34 {dimension_numbers = #tpu.dot_dimension_numbers<[1], [0], [0], [1], [0, 0, 1, 1], [], []>} : vector<8x128xbf16>, vector<128x128xbf16>, vector<8x128xf32> -> vector<8x128xf32>
      %c0_35 = arith.constant 0 : index
      %c0_36 = arith.constant 0 : index
      %62 = vector.load %arg12[%c0_35, %c0_36] : memref<1x128xf32, #tpu.memory_space<vmem>>, vector<1x128xf32>
      %63 = vector.broadcast %62 : vector<1x128xf32> to vector<8x128xf32>
      %64 = arith.addf %61, %63 : vector<8x128xf32>
      %65 = math.tanh %64 : vector<8x128xf32>
      %c0_37 = arith.constant 0 : index
      %c0_38 = arith.constant 0 : index
      %66 = vector.load %arg13[%c0_37, %c0_38] : memref<8x128xf32, #tpu.memory_space<vmem>>, vector<8x128xf32>
      tpu.vector_store %arg13[%c0_37, %c0_38], %65 {strides = array<i32>} : memref<8x128xf32, #tpu.memory_space<vmem>>, vector<8x128xf32>,
    } else {
    }
    return
  }
  func.func @transform_0(%arg0: i32, %arg1: i32) -> (i32, i32) {
    %c0_i32 = arith.constant 0 : i32
    return %arg1, %arg0 : i32, i32
  }
  func.func @transform_1(%arg0: i32, %arg1: i32) -> (i32, i32) {
    %c0_i32 = arith.constant 0 : i32
    %c0_i32_0 = arith.constant 0 : i32
    return %arg0, %c0_i32 : i32, i32
  }
  func.func @transform_2(%arg0: i32, %arg1: i32) -> (i32, i32) {
    %c0_i32 = arith.constant 0 : i32
    %c0_i32_0 = arith.constant 0 : i32
    %c0_i32_1 = arith.constant 0 : i32
    return %c0_i32, %c0_i32_0 : i32, i32
  }
  func.func @transform_3(%arg0: i32, %arg1: i32) -> (i32, i32) {
    %c0_i32 = arith.constant 0 : i32
    %c0_i32_0 = arith.constant 0 : i32
    %c0_i32_1 = arith.constant 0 : i32
    return %c0_i32, %c0_i32_0 : i32, i32
  }
  func.func @transform_4(%arg0: i32, %arg1: i32) -> (i32, i32) {
    %c0_i32 = arith.constant 0 : i32
    %c0_i32_0 = arith.constant 0 : i32
    %c0_i32_1 = arith.constant 0 : i32
    return %c0_i32, %c0_i32_0 : i32, i32
  }
  func.func @transform_5(%arg0: i32, %arg1: i32) -> (i32, i32) {
    %c0_i32 = arith.constant 0 : i32
    %c0_i32_0 = arith.constant 0 : i32
    %c0_i32_1 = arith.constant 0 : i32
    return %c0_i32, %c0_i32_0 : i32, i32
  }
  func.func @transform_6(%arg0: i32, %arg1: i32) -> (i32, i32) {
    %c0_i32 = arith.constant 0 : i32
    %c0_i32_0 = arith.constant 0 : i32
    %c0_i32_1 = arith.constant 0 : i32
    return %c0_i32, %c0_i32_0 : i32, i32
  }
  func.func @transform_7(%arg0: i32, %arg1: i32) -> (i32, i32) {
    %c0_i32 = arith.constant 0 : i32
    %c0_i32_0 = arith.constant 0 : i32
    %c0_i32_1 = arith.constant 0 : i32
    return %c0_i32, %c0_i32_0 : i32, i32
  }
  func.func @transform_8(%arg0: i32, %arg1: i32) -> (i32, i32) {
    %c0_i32 = arith.constant 0 : i32
    %c0_i32_0 = arith.constant 0 : i32
    %c0_i32_1 = arith.constant 0 : i32
    return %c0_i32, %c0_i32_0 : i32, i32
  }
  func.func @transform_9(%arg0: i32, %arg1: i32) -> (i32, i32) {
    %c0_i32 = arith.constant 0 : i32
    %c0_i32_0 = arith.constant 0 : i32
    %c0_i32_1 = arith.constant 0 : i32
    return %c0_i32, %c0_i32_0 : i32, i32
  }
  func.func @transform_10(%arg0: i32, %arg1: i32) -> (i32, i32) {
    %c0_i32 = arith.constant 0 : i32
    %c0_i32_0 = arith.constant 0 : i32
    %c0_i32_1 = arith.constant 0 : i32
    return %c0_i32, %c0_i32_0 : i32, i32
  }
  func.func @transform_11(%arg0: i32, %arg1: i32) -> (i32, i32) {
    %c0_i32 = arith.constant 0 : i32
    %c0_i32_0 = arith.constant 0 : i32
    return %arg1, %c0_i32 : i32, i32
  }
}

</mosaic_0001>

<bundles_post_ra>
// kernel: tpu_custom_call.1
= control target key start
LH: loop header
LB: loop body
LE: loop exit
PB: predicated region body
PF: predicated region fallthrough
CT: control target
= control target key end

     0   :  { %16 = vsyncpa [#allocation4], 0  ;;  %s960_s0 = inlined_call_operand.hbm [shape: bf16[8,128], index: 0, kind: input, shape index: {}]   ;;  %s961_s1 = inlined_call_operand.hbm [shape: bf16[128,128], index: 1, kind: input, shape index: {}]   ;;  %s962_s2 = inlined_call_operand.vmem [shape: f32[1,128], index: 2, kind: input, shape index: {}]   ;;  %s963_s3 = inlined_call_operand.vmem [shape: f32[1,128], index: 3, kind: input, shape index: {}]   ;;  %s964_s4 = inlined_call_operand.vmem [shape: f32[1,128], index: 4, kind: input, shape index: {}]   ;;  %s965_s5 = inlined_call_operand.hbm [shape: bf16[128,128], index: 5, kind: input, shape index: {}]   ;;  %s966_s6 = inlined_call_operand.vmem [shape: f32[1,128], index: 6, kind: input, shape index: {}]   ;;  %s967_s7 = inlined_call_operand.hbm [shape: bf16[128,128], index: 7, kind: input, shape index: {}]   ;;  %s968_s8 = inlined_call_operand.vmem [shape: f32[1,128], index: 8, kind: input, shape index: {}]   ;;  %s969_s9 = inlined_call_operand.hbm [shape: bf16[128,128], index: 9, kind: input, shape index: {}]   ;;  %s970_s10 = inlined_call_operand.vmem [shape: f32[1,128], index: 10, kind: input, shape index: {}]   ;;  %s971_s11 = inlined_call_operand.hbm [shape: f32[8,128], index: 11, kind: output, shape index: {}]  }
   0x1   :  { %17 = vsyncpa [#allocation7], 0 }
   0x2   :  { %18 = vsyncpa [#allocation10], 0  ;;  %s35_s19 = sshll.u32 %s961_s1, 4  ;;  %s36_s19 = int_to_ptr.hbm [resolvable:$true] %s35_s19 }
   0x3   :  { %19 = vsyncpa [#allocation5], 0  ;;  %s856_s20 = smov [#allocation6]   ;;  %s69_s24 = sshll.u32 %s967_s7, 4  ;;  %s70_s24 = int_to_ptr.hbm [resolvable:$true] %s69_s24 }
   0x4   :  { %s37_s21 = sshll.u32 %s856_s20, 4  ;;  %s857_s25 = smov 64   ;;  %s38_s21 = int_to_ptr.vmem [resolvable:$true] %s37_s21 }
   0x5   :  { %s858_s26 = smov 4   ;;  %s859_s27 = smov [#allocation9]  }
   0x6   :  { %43 = dma.hbm_to_vmem [thread:$0]  %s36_s19, 1024, %s38_s21, [#allocation7], %s857_s25, %s857_s25, %s858_s26  }
   0x7   :  { %s71_s28 = sshll.u32 %s859_s27, 4  ;;  %s25_s12 = sshll.u32 %s960_s0, 4  ;;  %s72_s28 = int_to_ptr.vmem [resolvable:$true] %s71_s28  ;;  %s26_s12 = int_to_ptr.hbm [resolvable:$true] %s25_s12 }
   0x8   :  { %77 = dma.hbm_to_vmem [thread:$0]  %s70_s24, 1024, %s72_s28, [#allocation10], %s857_s25, %s857_s25, %s858_s26  }
   0x9   :  { %s54_s14 = sshll.u32 %s965_s5, 4  ;;  %s860_s15 = smov [#allocation3]   ;;  %s55_s14 = int_to_ptr.hbm [resolvable:$true] %s54_s14 }
   0xa   :  { %s27_s16 = sshll.u32 %s860_s15, 4  ;;  %s861_s7 = smov [#allocation8]   ;;  %s28_s16 = int_to_ptr.vmem [resolvable:$true] %s27_s16 }
   0xb   :  { %30 = dma.hbm_to_vmem [thread:$0]  %s26_s12, 64, %s28_s16, [#allocation4]  }
   0xc   :  { %s56_s17 = sshll.u32 %s861_s7, 4  ;;  %s84_s20 = sshll.u32 %s969_s9, 4  ;;  %s57_s17 = int_to_ptr.vmem [resolvable:$true] %s56_s17  ;;  %s85_s20 = int_to_ptr.hbm [resolvable:$true] %s84_s20 }
   0xd   :  { %62 = dma.hbm_to_vmem [thread:$0]  %s55_s14, 1024, %s57_s17, [#allocation7], %s857_s25, %s857_s25, %s858_s26  }
   0xe   :  { %s862_s0 = smov [#allocation11]  }
   0xf   :  { %s86_s21 = sshll.u32 %s862_s0, 4  ;;  %s87_s21 = int_to_ptr.vmem [resolvable:$true] %s86_s21 }
  0x10   :  { %92 = dma.hbm_to_vmem [thread:$0]  %s85_s20, 1024, %s87_s21, [#allocation10], %s857_s25, %s857_s25, %s858_s26  }
  0x11   :  { %848 = dma.done.wait [#allocation4], 64  }
  0x12   :  { %849 = vsyncadd [#allocation4], 4294967232 }
  0x13   :  { %850 = dma.done.wait [#allocation7], 2048  }
  0x14   :  { %851 = vsyncadd [#allocation7], 4294965248 }
  0x15   :  { %852 = dma.done.wait [#allocation10], 2048  }
  0x16   :  { %853 = vsyncadd [#allocation10], 4294965248  ;;  %v659_v0 = vld [vmem:[#allocation6 + $0x38] sm:$0xff]  ;;  %v658_v1 = vld [vmem:[#allocation6 + $0x30] sm:$0xff]  ;;  %v224_v13 = vlaneseq  ;;  %s863_s28 = smov [#allocation12]   ;;  %s512_s1 = sshll.u32 %s971_s11, 4  ;;  %s513_s1 = int_to_ptr.hbm [resolvable:$true] %s512_s1 }
  0x17   :  { %180 = vmatpush.bf16.msra.mxu0 %v659_v0  ;;  %v657_v2 = vld [vmem:[#allocation6 + $0x28] sm:$0xff]  ;;  %v656_v3 = vld [vmem:[#allocation6 + $0x20] sm:$0xff]  ;;  %v655_v4 = vld [vmem:[#allocation6 + $0x18] sm:$0xff]  ;;  %s510_s29 = sshll.u32 %s863_s28, 4  ;;  %s511_s29 = int_to_ptr.vmem [resolvable:$true] %s510_s29 }
  0x18   :  { %v654_v5 = vld [vmem:[#allocation6 + $0x10] sm:$0xff]  ;;  %v653_v6 = vld [vmem:[#allocation6 + $0x8] sm:$0xff]  ;;  %v652_v7 = vld [vmem:[#allocation6] sm:$0xff]  ;;  %v225_v14 = vand.u32 127, %v224_v13 }
  0x19   :  { %v115_v8 = vld [vmem:[#allocation3] sm:$0xf]  ;;  %v666_v21 = vld [vmem:[#allocation8 + $0x30] sm:$0xff]  ;;  %v665_v22 = vld [vmem:[#allocation8 + $0x28] sm:$0xff] }
  0x1a   :  { %v692_v9 = vld [vmem:[%s962_s2] ss:$0 sm:$0xff]  ;;  %vm226_vm0 = vcmp.lt.s32.totalorder %v225_v14, 32  ;;  %v664_v23 = vld [vmem:[#allocation8 + $0x20] sm:$0xff]  ;;  %v662_v25 = vld [vmem:[#allocation8 + $0x10] sm:$0xff] }
  0x1b   :  { %181 = vmatpush.bf16.msra.mxu0 %v658_v1  ;;  %v667_v20 = vld [vmem:[#allocation8 + $0x38] sm:$0xff]  ;;  %v661_v26 = vld [vmem:[#allocation8 + $0x8] sm:$0xff]  ;;  %v660_v27 = vld [vmem:[#allocation8] sm:$0xff] }
  0x1c   :  { %324 = vmatpush.bf16.msra.mxu1 %v667_v20  ;;  %v663_v24 = vld [vmem:[#allocation8 + $0x18] sm:$0xff]  ;;  %v674_v32 = vld [vmem:[#allocation9 + $0x30] sm:$0xff]  ;;  %v673_v35 = vld [vmem:[#allocation9 + $0x28] sm:$0xff] }
  0x1d   :  { %v675_v31 = vld [vmem:[#allocation9 + $0x38] sm:$0xff]  ;;  %v672_v38 = vld [vmem:[#allocation9 + $0x20] sm:$0xff]  ;;  %v670_v46 = vld [vmem:[#allocation9 + $0x10] sm:$0xff] }
  0x1e   :  { %407 = vmatpush.bf16.msra.mxu2 %v675_v31  ;;  %v671_v41 = vld [vmem:[#allocation9 + $0x18] sm:$0xff]  ;;  %v669_v51 = vld [vmem:[#allocation9 + $0x8] sm:$0xff]  ;;  %v668_v52 = vld [vmem:[#allocation9] sm:$0xff] }
  0x1f   :  { %182 = vmatpush.bf16.msra.mxu0 %v657_v2  ;;  %v693_v42 = vld [vmem:[%s963_s3] ss:$0 sm:$0xff]  ;;  %v682_v54 = vld [vmem:[#allocation11 + $0x30] sm:$0xff]  ;;  %v681_v55 = vld [vmem:[#allocation11 + $0x28] sm:$0xff] }
  0x20   :  { %325 = vmatpush.bf16.msra.mxu1 %v666_v21  ;;  %v694_v45 = vld [vmem:[%s964_s4] ss:$0 sm:$0xff]  ;;  %v680_v56 = vld [vmem:[#allocation11 + $0x20] sm:$0xff]  ;;  %v678_v58 = vld [vmem:[#allocation11 + $0x10] sm:$0xff] }
  0x21   :  { %v683_v53 = vld [vmem:[#allocation11 + $0x38] sm:$0xff]  ;;  %v677_v1 = vld [vmem:[#allocation11 + $0x8] sm:$0xff]  ;;  %v676_v2 = vld [vmem:[#allocation11] sm:$0xff] }
  0x22   :  { %408 = vmatpush.bf16.msra.mxu2 %v674_v32  ;;  %490 = vmatpush.bf16.msra.mxu3 %v683_v53  ;;  %v679_v57 = vld [vmem:[#allocation11 + $0x18] sm:$0xff] }
  0x23   :  { %183 = vmatpush.bf16.msra.mxu0 %v656_v3  ;;  %v695_v59 = vld [vmem:[%s966_s6] ss:$0 sm:$0xff] }
  0x24   :  { %326 = vmatpush.bf16.msra.mxu1 %v665_v22  ;;  %v696_v3 = vld [vmem:[%s968_s8] ss:$0 sm:$0xff] }
  0x26   :  { %409 = vmatpush.bf16.msra.mxu2 %v673_v35  ;;  %491 = vmatpush.bf16.msra.mxu3 %v682_v54 }
  0x27   :  { %184 = vmatpush.bf16.msra.mxu0 %v655_v4 }
  0x28   :  { %327 = vmatpush.bf16.msra.mxu1 %v664_v23 }
  0x2a   :  { %410 = vmatpush.bf16.msra.mxu2 %v672_v38  ;;  %492 = vmatpush.bf16.msra.mxu3 %v681_v55 }
  0x2b   :  { %185 = vmatpush.bf16.msra.mxu0 %v654_v5 }
  0x2c   :  { %328 = vmatpush.bf16.msra.mxu1 %v663_v24 }
  0x2e   :  { %411 = vmatpush.bf16.msra.mxu2 %v671_v41  ;;  %493 = vmatpush.bf16.msra.mxu3 %v680_v56 }
  0x2f   :  { %186 = vmatpush.bf16.msra.mxu0 %v653_v6 }
  0x30   :  { %329 = vmatpush.bf16.msra.mxu1 %v662_v25 }
  0x32   :  { %412 = vmatpush.bf16.msra.mxu2 %v670_v46  ;;  %494 = vmatpush.bf16.msra.mxu3 %v679_v57 }
  0x33   :  { %187 = vmatpush.bf16.msra.mxu0 %v652_v7 }
  0x34   :  { %330 = vmatpush.bf16.msra.mxu1 %v661_v26 }
  0x36   :  { %188 = vmatmul.bf16.vlgmr.msra.gmra.mxu0 %v115_v8  ;;  %413 = vmatpush.bf16.msra.mxu2 %v669_v51 }
  0x37   :  { %495 = vmatpush.bf16.msra.mxu3 %v678_v58 }
  0x38   :  { %331 = vmatpush.bf16.msra.mxu1 %v660_v27 }
  0x3a   :  { %414 = vmatpush.bf16.msra.mxu2 %v668_v52 }
  0x3b   :  { %496 = vmatpush.bf16.msra.mxu3 %v677_v1 }
  0x3f   :  { %497 = vmatpush.bf16.msra.mxu3 %v676_v2 }
  0xb3   :  { %v189_v10 = vpop.f32.mrf.mxu0 }
  0xb4   :  { %v201_v11 = vadd.f32 %v692_v9, %v189_v10  ;;  %v697_v9 = vld [vmem:[%s970_s10] ss:$0 sm:$0xff] }
  0xb6   :  { %220 = vadd.xlane.f32.xlu0 %v201_v11 }
  0xbb   :  { %v191_v12 = vpop.f32.mrf.mxu0 }
 0x129   :  { %v221_v15 = vpop.xlane.xlu0 %220 }
 0x12a   :  { %v222_v16 = vmul.f32 0.03125, %v221_v15 }
 0x12c   :  { %v223_v17 = vsub.f32 %v201_v11, %v222_v16 }
 0x12e   :  { %v227_v18 = vsel %vm226_vm0, %v223_v17, 0.0 }
 0x12f   :  { %v228_v19 = vmul.f32 %v227_v18, %v227_v18 }
 0x131   :  { %229 = vadd.xlane.f32.xlu0 %v228_v19 }
 0x1a4   :  { %v230_v28 = vpop.xlane.xlu0 %229 }
 0x1a5   :  { %v231_v29 = vmul.f32 0.03125, %v230_v28 }
 0x1a7   :  { %v232_v30 = vadd.f32 1e-05, %v231_v29 }
 0x1a9   :  { %698 = vrsqrt.f32 %v232_v30  ;;  %vm239_vm2 = vweird.f32 %v232_v30 }
 0x1af   :  { %v699_v33 = vpop.eup %698 }
 0x1b0   :  { %v234_v34 = vmul.f32 %v699_v33, %v232_v30  ;;  %vm240_vm1 = vweird.f32 %v699_v33 }
 0x1b1   :  { %vm241_vm3 = vmor %vm239_vm2, %vm240_vm1 }
 0x1b2   :  { %v235_v36 = vmul.f32 %v699_v33, %v234_v34 }
 0x1b4   :  { %v236_v37 = vmul.f32 0.5, %v235_v36 }
 0x1b6   :  { %v237_v39 = vsub.f32 1.5, %v236_v37 }
 0x1b8   :  { %v238_v40 = vmul.f32 %v699_v33, %v237_v39 }
 0x1ba   :  { %v242_v43 = vsel %vm241_vm3, %v699_v33, %v238_v40 }
 0x1bb   :  { %v243_v44 = vmul.f32 %v242_v43, %v227_v18 }
 0x1bd   :  { %v248_v47 = vmul.f32 %v693_v42, %v243_v44 }
 0x1bf   :  { %v253_v48 = vadd.f32 %v694_v45, %v248_v47 }
 0x1c1   :  { %700 = vtanh.f32 %v253_v48 }
 0x1c7   :  { %v701_v49 = vpop.eup %700 }
 0x1c8   :  { %v255_v50 = vpack.c.bf16 %v701_v49, %v701_v49 }
 0x1ca   :  { %332 = vmatmul.bf16.vlgmr.msra.gmra.mxu1 %v255_v50 }
 0x247   :  { %v333_v60 = vpop.f32.mrf.mxu1 }
 0x248   :  { %v334_v61 = vadd.f32 %v695_v59, %v333_v60 }
 0x24a   :  { %v337_v62 = vmax.f32 %v334_v61, 0.0 }
 0x24c   :  { %v338_v63 = vpack.c.bf16 %v337_v62, %v337_v62 }
 0x24e   :  { %415 = vmatmul.bf16.vlgmr.msra.gmra.mxu2 %v338_v63 }
 0x24f   :  { %v335_v0 = vpop.f32.mrf.mxu1 }
 0x2d1   :  { %v416_v4 = vpop.f32.mrf.mxu2 }
 0x2d2   :  { %v417_v5 = vadd.f32 %v696_v3, %v416_v4 }
 0x2d4   :  { %v420_v6 = vmax.f32 %v417_v5, 0.0 }
 0x2d6   :  { %v421_v7 = vpack.c.bf16 %v420_v6, %v420_v6 }
 0x2d8   :  { %498 = vmatmul.bf16.vlgmr.msra.gmra.mxu3 %v421_v7 }
 0x2d9   :  { %v418_v8 = vpop.f32.mrf.mxu2 }
 0x35b   :  { %v499_v10 = vpop.f32.mrf.mxu3 }
 0x35c   :  { %v500_v11 = vadd.f32 %v697_v9, %v499_v10 }
 0x35e   :  { %702 = vtanh.f32 %v500_v11 }
 0x363   :  { %v501_v12 = vpop.f32.mrf.mxu3 }
 0x364   :  { %v703_v13 = vpop.eup %702 }
 0x365   :  { %504 = vst [vmem:[#allocation12] sm:$0xff] %v703_v13 }
 0x366   :  { %515 = dma.vmem_to_hbm [thread:$0]  %s511_s29, 128, %s513_s1, [#allocation5]  }
 0x367   :  { %854 = dma.done.wait [#allocation5], 128  }
 0x368   :  { %855 = vsyncadd [#allocation5], 4294967168 }
 0x369   :  { %520 = vsyncpa [#allocation4], 1 }
 0x36a   :  { %521 = vsyncpa [#allocation7], 1 }
 0x36b   :  { %522 = vsyncpa [#allocation10], 1 }
 0x36c   :  { %523 = vsyncpa [#allocation5], 1 }

</bundles_post_ra>
